<compile_context>
chip_gen: v7x
topology: tpu7x:2x2x1
jax: 0.10.0
libtpu: 0.0.40
codegen_flags: <defaults>
</compile_context>

<pallas_src>
import jax
import jax.numpy as jnp
from jax.experimental import pallas as pl
from jax.experimental.pallas import tpu as pltpu


def _round_up(x, m):
    return ((x + m - 1) // m) * m


def _vmem_config():
    """Generation-aware VMEM sizing.

    Returns (budget_bytes, vmem_limit_bytes).  `budget` is what live
    (double-buffered) blocks are admitted against; `vmem_limit` is passed to
    the compiler so the default scoped limit (16 MiB v5e / 32 MiB v6e,v7x)
    never caps us.  Physical VMEM: 128 MiB v5e/v6e, 64 MiB per TC on v7x.
    """
    try:
        cap = int(pltpu.get_tpu_info().vmem_capacity_bytes)
    except Exception:
        cap = None
    if not cap or cap < (16 << 20) or cap > (512 << 20):
        cap = 64 << 20                        # v7x-safe fallback
    vmem_limit = min(int(cap * 0.90), 116 << 20)
    budget = min(int(cap * 0.70), 96 << 20)   # headroom: compiler scratch etc.
    return budget, vmem_limit


# ---------------------------------------------------------------------------
# Fused single-pass kernel: one batch element per grid step.
# ---------------------------------------------------------------------------
def _self_gating_fused_kernel(x_ref, w_ref, b_ref, o_ref):
    # x_ref: (1, C, S)  w_ref: (C, C) f32 pre-scaled by 1/S  b_ref: (C, 1) f32
    x = x_ref[0]                                                    # (C, S)
    # f32 accumulation of the spatiotemporal sum; x stays in its own dtype.
    ssum = jnp.sum(x, axis=-1, keepdims=True, dtype=jnp.float32)    # (C, 1)
    y = jnp.dot(w_ref[...], ssum, preferred_element_type=jnp.float32) + b_ref[...]
    gate = jax.nn.sigmoid(y).astype(x.dtype)                        # (C, 1)
    # Broadcast multiply in the input dtype (no full-tile f32 temporary).
    o_ref[0] = gate * x


# ---------------------------------------------------------------------------
# Tiled path, kernel 1: per-(batch, S-tile) sums accumulated in f32.
# Ragged tail masked in-kernel (out-of-bounds lanes of the last block read
# garbage), so the wrapper never pads x.
# ---------------------------------------------------------------------------
def _make_reduce_kernel(S, tS):
    ragged = (S % tS) != 0

    def _reduce_kernel(x_ref, sum_ref):
        si = pl.program_id(1)

        @pl.when(si == 0)
        def _():
            sum_ref[...] = jnp.zeros_like(sum_ref)

        x = x_ref[...]                                          # (1, C, tS)
        if ragged:
            lane = jax.lax.broadcasted_iota(jnp.int32, x.shape, 2)
            x = jnp.where(si * tS + lane < S, x, jnp.zeros_like(x))
        sum_ref[...] += jnp.sum(x, axis=-1, keepdims=True, dtype=jnp.float32)

    return _reduce_kernel


# ---------------------------------------------------------------------------
# Tiled path, kernel 2: lane-dense streaming broadcast multiply.
# Partial last S block: garbage lanes are read, but Pallas masks the
# out-of-bounds writeback, so no explicit mask (and no padded output) needed.
# ---------------------------------------------------------------------------
def _apply_kernel(gate_ref, x_ref, o_ref):
    # gate_ref: (1, C, 1) in x dtype   x_ref / o_ref: (1, C, tS)
    o_ref[...] = gate_ref[...] * x_ref[...]


def _pick_tiles(C, itemsize, S, budget, max_tile_s):
    """Per-kernel S tile sizes, derived from the VMEM budget (not a lane cap)."""
    s_cap = _round_up(max(S, 1), 128)
    if max_tile_s is not None:
        s_cap = min(s_cap, _round_up(max(max_tile_s, 1), 128))

    def _fit(n_live_blocks):
        ts = budget // (n_live_blocks * C * itemsize)
        ts = max(128, (ts // 128) * 128)      # lane-dense, multiple of 128
        return min(ts, s_cap)

    ts_reduce = _fit(2)   # one streamed input x 2 buffers; (1,C,1) acc is tiny
    ts_apply = _fit(4)    # streamed input + output, each double-buffered
    return ts_reduce, ts_apply


def self_gating(x, w, b, *, force_tiled=False, alias_input=False, max_tile_s=None):
    """x: [B, C, T, H, W], w: [C, C] (nn.Linear weight), b: [C] (bias)."""
    B, C, T, H, W = x.shape
    S = T * H * W
    itemsize = jnp.dtype(x.dtype).itemsize
    x3 = x.reshape(B, C, S)

    w32 = w.astype(jnp.float32)
    b32 = b.astype(jnp.float32)

    budget, vmem_limit = _vmem_config()
    ts_reduce, ts_apply = _pick_tiles(C, itemsize, S, budget, max_tile_s)
    n_reduce = pl.cdiv(S, ts_reduce)
    n_apply = pl.cdiv(S, ts_apply)

    # Fused admission: in + out per-batch slabs (double-buffered) plus the
    # double-buffered FC params must fit the budget.  On multi-TensorCore
    # parts (v7x) a single-step fused grid (B == 1) leaves one core idle, so
    # prefer the tiled path there unless tiled would also be single-step.
    fused_bytes = 4 * C * S * itemsize + 2 * (C * C + C) * 4
    use_fused = (not force_tiled
                 and fused_bytes <= budget
                 and (B >= 2 or B * n_apply < 2))

    if use_fused:
        w_scaled = w32 * (1.0 / S)            # fold 1/S -> kernel only sums
        b2 = b32.reshape(C, 1)
        out = pl.pallas_call(
            _self_gating_fused_kernel,
            out_shape=jax.ShapeDtypeStruct((B, C, S), x.dtype),
            grid_spec=pltpu.PrefetchScalarGridSpec(
                num_scalar_prefetch=0,
                grid=(B,),
                in_specs=[
                    pl.BlockSpec((1, C, S), lambda i: (i, 0, 0)),
                    pl.BlockSpec((C, C), lambda i: (0, 0)),
                    pl.BlockSpec((C, 1), lambda i: (0, 0)),
                ],
                out_specs=pl.BlockSpec((1, C, S), lambda i: (i, 0, 0)),
            ),
            compiler_params=pltpu.CompilerParams(
                dimension_semantics=("parallel",),
                vmem_limit_bytes=vmem_limit),
            input_output_aliases=({0: 0} if alias_input else {}),
        )(x3, w_scaled, b2)
        return out.reshape(B, C, T, H, W)

    # ------------------------- tiled two-kernel path -------------------------
    # 1) per-batch channel sums: f32 accumulation over the "arbitrary" S axis,
    #    ragged tail masked in-kernel (no jnp.pad of x).
    sums = pl.pallas_call(
        _make_reduce_kernel(S, ts_reduce),
        out_shape=jax.ShapeDtypeStruct((B, C, 1), jnp.float32),
        grid_spec=pltpu.PrefetchScalarGridSpec(
            num_scalar_prefetch=0,
            grid=(B, n_reduce),
            in_specs=[pl.BlockSpec((1, C, ts_reduce), lambda bi, si: (bi, 0, si))],
            out_specs=pl.BlockSpec((1, C, 1), lambda bi, si: (bi, 0, 0)),
        ),
        compiler_params=pltpu.CompilerParams(
            dimension_semantics=("parallel", "arbitrary"),
            vmem_limit_bytes=vmem_limit),
    )(x3)

    # 2) tiny CxC FC + sigmoid, hoisted off the streamed path (plain JAX, f32)
    avg = sums[:, :, 0] * (1.0 / S)                            # (B, C)
    gate = jax.nn.sigmoid(avg @ w32.T + b32).astype(x.dtype)   # (B, C)
    gate = gate.reshape(B, C, 1)

    # 3) lane-dense streaming multiply; output allocated at S exactly, the
    #    partial last block relies on Pallas' masked writeback (no post-slice).
    out = pl.pallas_call(
        _apply_kernel,
        out_shape=jax.ShapeDtypeStruct((B, C, S), x.dtype),
        grid_spec=pltpu.PrefetchScalarGridSpec(
            num_scalar_prefetch=0,
            grid=(B, n_apply),
            in_specs=[
                pl.BlockSpec((1, C, 1), lambda bi, si: (bi, 0, 0)),
                pl.BlockSpec((1, C, ts_apply), lambda bi, si: (bi, 0, si)),
            ],
            out_specs=pl.BlockSpec((1, C, ts_apply), lambda bi, si: (bi, 0, si)),
        ),
        compiler_params=pltpu.CompilerParams(
            dimension_semantics=("parallel", "parallel"),
            vmem_limit_bytes=vmem_limit),
        input_output_aliases=({1: 0} if alias_input else {}),
    )(gate, x3)

    return out.reshape(B, C, T, H, W)


def self_gating_ref(x, w, b):
    """Pure-JAX reference matching the PyTorch forward."""
    avg = jnp.mean(x, axis=(2, 3, 4))                 # [B, C]
    weights = jax.nn.sigmoid(avg @ w.T + b)           # [B, C]
    return weights[:, :, None, None, None] * x


if __name__ == "__main__":
    key = jax.random.PRNGKey(0)
    kx, kw, kb, kx2 = jax.random.split(key, 4)

    B, C, T, H, W = 2, 4, 4, 8, 8                     # S = 256 (lane-aligned)
    x = jax.random.normal(kx, (B, C, T, H, W), dtype=jnp.float32)

    # Deterministic nn.Linear(C, C) init (uniform(-1/sqrt(C), 1/sqrt(C)))
    bound = 1.0 / jnp.sqrt(jnp.float32(C))
    w = jax.random.uniform(kw, (C, C), dtype=jnp.float32, minval=-bound, maxval=bound)
    b = jax.random.uniform(kb, (C,), dtype=jnp.float32, minval=-bound, maxval=bound)

    ref = self_gating_ref(x, w, b)

    # Fused single-pass path (small slab -> fits VMEM budget, B >= 2)
    out_fused = jax.block_until_ready(self_gating(x, w, b))
    assert out_fused.shape == (B, C, T, H, W)
    assert jnp.allclose(out_fused, ref, atol=1e-5, rtol=1e-5), "fused path mismatch"

    # Tiled reduce + apply path (the large-shape code path), forced here
    out_tiled = jax.block_until_ready(self_gating(x, w, b, force_tiled=True))
    assert out_tiled.shape == (B, C, T, H, W)
    assert jnp.allclose(out_tiled, ref, atol=1e-5, rtol=1e-5), "tiled path mismatch"

    # Ragged S (130, not a multiple of 128) with a forced 128-lane tile:
    # exercises in-kernel tail masking in the reduce and Pallas' masked
    # partial-block writeback in the apply (no jnp.pad / post-slice anywhere).
    B2, T2, H2, W2 = 1, 2, 5, 13                      # S = 130
    x2 = jax.random.normal(kx2, (B2, C, T2, H2, W2), dtype=jnp.float32)
    ref2 = self_gating_ref(x2, w, b)
    out_ragged = jax.block_until_ready(
        self_gating(x2, w, b, force_tiled=True, max_tile_s=128))
    assert out_ragged.shape == (B2, C, T2, H2, W2)
    assert jnp.allclose(out_ragged, ref2, atol=1e-5, rtol=1e-5), "ragged path mismatch"

    print("KERNEL_OK")
</pallas_src>

<mosaic_0001>
module attributes {stable_mosaic.version = 11 : i64} {
  func.func @_self_gating_fused_kernel(%arg0: i32, %arg1: memref<1x4x256xf32, #tpu.memory_space<vmem>>, %arg2: memref<4x4xf32, #tpu.memory_space<vmem>>, %arg3: memref<4x1xf32, #tpu.memory_space<vmem>>, %arg4: memref<1x4x256xf32, #tpu.memory_space<vmem>>) attributes {dimension_semantics = [#tpu.dimension_semantics<parallel>], iteration_bounds = array<i64: 2>, scalar_prefetch = 0 : i64, scratch_operands = 0 : i64, tpu.core_type = #tpu.core_type<tc>, window_params = [{transform_indices = @transform_0, window_bounds = array<i64: 1, 4, 256>}, {pipeline_mode = #tpu.pipeline_mode<synchronous>, transform_indices = @transform_1, window_bounds = array<i64: 4, 4>}, {pipeline_mode = #tpu.pipeline_mode<synchronous>, transform_indices = @transform_2, window_bounds = array<i64: 4, 1>}, {transform_indices = @transform_3, window_bounds = array<i64: 1, 4, 256>}]} {
    %c0 = arith.constant 0 : index
    %c0_0 = arith.constant 0 : index
    %c0_1 = arith.constant 0 : index
    %0 = vector.load %arg1[%c0, %c0_0, %c0_1] : memref<1x4x256xf32, #tpu.memory_space<vmem>>, vector<1x4x256xf32>
    %1 = vector.shape_cast %0 : vector<1x4x256xf32> to vector<4x256xf32>
    %cst = arith.constant dense<0.000000e+00> : vector<4xf32>
    %2 = vector.multi_reduction <add>, %1, %cst [1] : vector<4x256xf32> to vector<4xf32>
    %3 = vector.shape_cast %2 : vector<4xf32> to vector<4x1xf32>
    %c0_2 = arith.constant 0 : index
    %c0_3 = arith.constant 0 : index
    %4 = vector.load %arg2[%c0_2, %c0_3] : memref<4x4xf32, #tpu.memory_space<vmem>>, vector<4x4xf32>
    %cst_4 = arith.constant dense<0.000000e+00> : vector<4x1xf32>
    %5 = tpu.matmul %4, %3, %cst_4 {dimension_numbers = #tpu.dot_dimension_numbers<[1], [0], [0], [1], [0, 0, 1, 1], [], []>} : vector<4x4xf32>, vector<4x1xf32>, vector<4x1xf32> -> vector<4x1xf32>
    %c0_5 = arith.constant 0 : index
    %c0_6 = arith.constant 0 : index
    %6 = vector.load %arg3[%c0_5, %c0_6] : memref<4x1xf32, #tpu.memory_space<vmem>>, vector<4x1xf32>
    %7 = arith.addf %5, %6 : vector<4x1xf32>
    %8 = arith.negf %7 : vector<4x1xf32>
    %9 = math.exp %8 : vector<4x1xf32>
    %cst_7 = arith.constant 1.000000e+00 : f32
    %10 = vector.broadcast %cst_7 : f32 to vector<4x1xf32>
    %11 = arith.addf %10, %9 : vector<4x1xf32>
    %12 = arith.divf %10, %11 : vector<4x1xf32>
    %13 = vector.broadcast %12 : vector<4x1xf32> to vector<4x256xf32>
    %14 = arith.mulf %13, %1 : vector<4x256xf32>
    %c0_8 = arith.constant 0 : index
    %c0_9 = arith.constant 0 : index
    %c0_10 = arith.constant 0 : index
    %15 = vector.load %arg4[%c0_8, %c0_9, %c0_10] : memref<1x4x256xf32, #tpu.memory_space<vmem>>, vector<1x4x256xf32>
    %16 = vector.shape_cast %15 : vector<1x4x256xf32> to vector<4x256xf32>
    %17 = vector.shape_cast %14 : vector<4x256xf32> to vector<1x4x256xf32>
    tpu.vector_store %arg4[%c0_8, %c0_9, %c0_10], %17 {strides = array<i32>} : memref<1x4x256xf32, #tpu.memory_space<vmem>>, vector<1x4x256xf32>,
    return
  }
  func.func @transform_0(%arg0: i32) -> (i32, i32, i32) {
    %c0_i32 = arith.constant 0 : i32
    %c0_i32_0 = arith.constant 0 : i32
    %c0_i32_1 = arith.constant 0 : i32
    return %arg0, %c0_i32, %c0_i32_0 : i32, i32, i32
  }
  func.func @transform_1(%arg0: i32) -> (i32, i32) {
    %c0_i32 = arith.constant 0 : i32
    %c0_i32_0 = arith.constant 0 : i32
    %c0_i32_1 = arith.constant 0 : i32
    return %c0_i32, %c0_i32_0 : i32, i32
  }
  func.func @transform_2(%arg0: i32) -> (i32, i32) {
    %c0_i32 = arith.constant 0 : i32
    %c0_i32_0 = arith.constant 0 : i32
    %c0_i32_1 = arith.constant 0 : i32
    return %c0_i32, %c0_i32_0 : i32, i32
  }
  func.func @transform_3(%arg0: i32) -> (i32, i32, i32) {
    %c0_i32 = arith.constant 0 : i32
    %c0_i32_0 = arith.constant 0 : i32
    %c0_i32_1 = arith.constant 0 : i32
    return %arg0, %c0_i32, %c0_i32_0 : i32, i32, i32
  }
}

</mosaic_0001>

<bundles_post_ra>
// kernel: tpu_custom_call.1
= control target key start
LH: loop header
LB: loop body
LE: loop exit
PB: predicated region body
PF: predicated region fallthrough
CT: control target
= control target key end

     0   :  { %8 = vsyncpa [#allocation3], 0  ;;  %s754_s0 = inlined_call_operand.hbm [shape: f32[2,4,256], index: 0, kind: input, shape index: {}]   ;;  %s755_s1 = inlined_call_operand.vmem [shape: f32[4,4], index: 1, kind: input, shape index: {}]   ;;  %s756_s2 = inlined_call_operand.vmem [shape: f32[4,1], index: 2, kind: input, shape index: {}]   ;;  %s757_s3 = inlined_call_operand.hbm [shape: f32[2,4,256], index: 3, kind: output, shape index: {}]  }
   0x1   :  { %10 = vsyncpa [#allocation3 + $0x1], 0 }
   0x2   :  { %11 = vsyncpa [#allocation4], 0 }
   0x3   :  { %13 = vsyncpa [#allocation4 + $0x1], 0  ;;  %s583_s12 = smov 0   ;;  %s585_s13 = smov 0  }
   0x4   :  { %s587_s14 = smov 0   ;;  %s589_s15 = smov 0  }
   0x5 LB: > { %s604_s16 = sadd.s32 4294967295, %s556_s15   ;;  %s379_s17 = sadd.s32 4294967294, %s556_s15   ;;  %s556_s15 = sphi %s589_s15, %s772_s15   ;;  %s552_s14 = sphi %s587_s14, %s771_s14   ;;  %s548_s13 = sphi %s585_s13, %s770_s13   ;;  %s544_s12 = sphi %s583_s12, %s769_s12  }
   0x6   : > { %s608_s18 = sadd.s32 1, %s556_s15   ;;  %s26_s19 = sadd.s32 1, %s552_s14 }
   0x7   : > { %s23_s20 = ssub.s32 %s556_s15, %s608_s18  ;;  %p33_p0 = scmp.ne.s32.totalorder %s552_s14, %s548_s13 }
   0x8   : > { %p24_p1 = scmp.eq.s32.totalorder %s23_s20, 0  ;;  %p34_p2 = scmp.eq.s32.totalorder %s556_s15, 0 }
   0x9   : > { %p39_p3 = scmp.ne.s32.totalorder %s548_s13, %s544_s12  ;;  %p40_p4 = scmp.eq.s32.totalorder %s604_s16, 0 }
   0xa   : > { %s620_s21 = scalar_select %p24_p1, %s552_s14, %s26_s19  }
   0xb   : > { %p622_p5 = por %p34_p2, %p33_p0  ;;  %p626_p6 = por %p40_p4, %p39_p3 }
   0xc   : > { %p105_p7 = scmp.eq.s32.totalorder %s604_s16, 1  ;;  %p111_p8 = scmp.eq.s32.totalorder %s379_s17, 1 }
   0xd   : > { %p417_p10 = scmp.lt.s32.totalorder %s556_s15, 2  ;;  %s137_s26 = sand.u32 1, %s552_s14  }
   0xe   : > { %p633_p11 = por %p105_p7, %p33_p0  ;;  %p637_p12 = por %p111_p8, %p39_p3 }
   0xf   : > { %s396_s27 = sshll.u32 %s556_s15, 7  ;;  %s382_s28 = sshll.u32 %s137_s26, 3 }
  0x10   : > { %s761_s24 = scalar_select %p633_p11, 1, 0 }
  0x11   : > { %s762_s25 = scalar_select %p637_p12, 1, 0 }
  0x12   : > { %s646_s4 = scalar_lea.hbm %s754_s0, %s396_s27  ;;  %s141_s5 = scalar_lea.vmem [#allocation2], %s382_s28 }
  0x13   : > { %s149_s6 = sshll.u32 %s141_s5, 4  ;;  %p650_p13 = pnand %p417_p10, %p622_p5  ;;  %s654_s6 = int_to_ptr.vmem [resolvable:$true] %s149_s6 }
  0x14   : > { %s138_s8 = scalar_lea.sflag [#allocation3], %s137_s26  ;;  %s460_s9 = scalar_lea.hbm %s646_s4, 128 }
  0x15   : > { %p461_p2 = scmp.ne.s32.totalorder %s646_s4, %s460_s9  ;;  %p462_p3 = pneg %p650_p13 }
  0x16   : > { %s465_s17 = scalar_lea.hbm %s754_s0, 256  ;;  %p466_p5 = scmp.lt.u32.totalorder %s646_s4, %s754_s0 }
  0x17   : > { %p463_p4 = pnand %p462_p3, %p461_p2  ;;  %p467_p8 = scmp.lt.u32.totalorder %s465_s17, %s460_s9 }
  0x18   : > { %p469_p9 = scmp.lt.u32.totalorder %s460_s9, %s646_s4 }
  0x19   : > { %p464_p7 = pneg %p463_p4  ;;  %p468_p10 = por %p467_p8, %p466_p5 }
  0x1b   : > { %p470_p0 = por %p469_p9, %p468_p10 }
  0x1d   : > { %p471_p1 = pnand %p470_p0, %p464_p7 }
  0x1f   : > { %474 = shalt.err (!%p471_p1)
}
  0x20   : > { %s475_s22 = scalar_lea.vmem %s654_s6, 128  ;;  %s558_s26 = smov [#allocation2]  }
  0x21   : > { %p476_p2 = scmp.ne.s32.totalorder %s654_s6, %s475_s22  ;;  %s480_s27 = sshll.u32 %s558_s26, 4  ;;  %s481_s27 = int_to_ptr.vmem [resolvable:$false] %s480_s27 }
  0x22   : > { %s482_s28 = scalar_lea.vmem %s481_s27, 256  ;;  %p483_p11 = scmp.lt.s32.totalorder %s654_s6, %s481_s27 }
  0x23   : > { %p478_p4 = pnand %p476_p2, %p462_p3  ;;  %p484_p5 = scmp.lt.s32.totalorder %s482_s28, %s475_s22 }
  0x25   : > { %p479_p12 = pneg %p478_p4  ;;  %p485_p8 = por %p484_p5, %p483_p11 }
  0x27   : > { %p486_p9 = pnand %p485_p8, %p479_p12 }
  0x29   : > { %489 = shalt.err (!%p486_p9)
}
  0x2a   : > { %412 = dma.hbm_to_vmem [thread:$0]  (!%p650_p13), %s646_s4, 128, %s654_s6, %s138_s8  }
  0x2b   : > { %p764_p0 = scmp.lt.s32.totalorder %s556_s15, 3  ;;  %p765_p1 = scmp.ge.s32.totalorder %s556_s15, 1 }
  0x2d   : > { %p155_p3 = pnand %p765_p1, %p764_p0 }
  0x2e   : > { %s688_s29 = sand.u32 (!%p155_p3), 1, %s548_s13  }
  0x2f   : > { %158 = sbr.rel (%p155_p3) target bundleno = 590 (0x24e), region = 32  ;;  %s386_s30 = sshll.u32 (!%p155_p3), %s688_s29, 3 }
  0x30   : > { %s161_s5 = scalar_lea.sflag (!%p155_p3), [#allocation3], %s688_s29  ;;  %s164_s7 = scalar_lea.vmem (!%p155_p3), [#allocation2], %s386_s30 }
  0x36   : > { %535 = dma.done.wait (%p626_p6), %s161_s5, 128  }
  0x37   : > { %537 = vsyncadd (%p626_p6), %s161_s5, 4294967168  ;;  %v559_v0 = vmov 0.0   ;;  %vm191_vm0 = vcmask 1043456   ;;  %v187_v1 = vld [vmem:[%s164_s7] sm:$0xff]  ;;  %vm560_vm1 = vmmov 0   ;;  %vm199_vm2 = vcmask 31744  }
  0x38   : > { %400 = vmatprep.subr.mxu0 %v559_v0  ;;  %v189_v2 = vcombine.high %v187_v1, %v187_v1  ;;  %v192_v3 = vsel %vm191_vm0, %v187_v1, 0.0  ;;  %402 = vmatprep.mubr.msk.f32.mxu0 %vm560_vm1, %v559_v0  ;;  %v197_v6 = vld [vmem:[%s755_s1] sm:$0xf]  ;;  %v561_v8 = vmov 0   ;;  %s397_s9 = sshll.u32 %s604_s16, 7  ;;  %s186_s10 = scalar_lea.vmem [#allocation5], %s386_s30 }
  0x39   : > { %454 = vset.pattern.permute.xlu0 %v561_v8  ;;  %v198_v9 = vld [vmem:[%s756_s2] sm:$0xf]  ;;  %s309_s11 = sshll.u32 %s186_s10, 4  ;;  %s710_s20 = scalar_lea.hbm %s757_s3, %s397_s9  ;;  %s712_s11 = int_to_ptr.vmem [resolvable:$true] %s309_s11 }
  0x3a   : > { %v193_v4 = vsel %vm191_vm0, %v189_v2, 0.0  ;;  %s295_s22 = scalar_lea.sflag [#allocation4], %s688_s29  ;;  %s490_s26 = scalar_lea.vmem %s712_s11, 128 }
  0x3b   : > { %v194_v5 = vadd.f32 %v193_v4, %v192_v3  ;;  %p491_p6 = scmp.ne.s32.totalorder %s712_s11, %s490_s26  ;;  %p766_p11 = scmp.ne.s32.totalorder %s761_s24, 0 }
  0x3c   : > { %s562_s16 = smov [#allocation5]  }
  0x3d   : > { %195 = vadd.xlane.f32.xlu0 %v194_v5  ;;  %p492_p12 = pnand %p491_p6, %p766_p11  ;;  %s494_s27 = sshll.u32 %s562_s16, 4  ;;  %s495_s27 = int_to_ptr.vmem [resolvable:$false] %s494_s27 }
  0x3e   : > { %s496_s28 = scalar_lea.vmem %s495_s27, 256  ;;  %p497_p7 = scmp.lt.s32.totalorder %s712_s11, %s495_s27 }
  0x3f   : > { %p493_p13 = pneg %p492_p12  ;;  %p498_p10 = scmp.lt.s32.totalorder %s496_s28, %s490_s26 }
  0x41   : > { %p499_p2 = por %p498_p10, %p497_p7 }
  0x43   : > { %p500_p4 = pnand %p499_p2, %p493_p13 }
  0xca   : > { %v196_v7 = vpop.xlane.xlu0 %195 }
  0xcb   : > { %401 = vmatpush3.msk.msra.mxu0 %vm191_vm0, %v196_v7 }
  0xcc   : > { %403 = vmatmul.mubr.msk.f32.vlgmr.msra.gmra.mrb[0].mxu0 %vm199_vm2, %v197_v6 }
 0x19f   : > { %v272_v10 = vpop.f32.mrb[0].mxu0 }
 0x1a0   : > { %v273_v11 = vadd.f32 %v272_v10, %v198_v9  ;;  %v404_v12 = vpop.f32.mrb[1].mxu0 }
 0x1a2   : > { %v390_v13 = vmul.f32 -1.442695, %v273_v11 }
 0x1a4   : > { %456 = vpow2.f32 %v390_v13 }
 0x1ae   : > { %v457_v14 = vpop.eup %456 }
 0x1af   : > { %v279_v15 = vadd.f32 1.0, %v457_v14 }
 0x1b1   : > { %458 = vrcp.f32 %v279_v15 }
 0x1bb   : > { %v459_v16 = vpop.eup %458 }
 0x1bc   : > { %284 = vperm.xlu0 %454, %v459_v16  }
 0x23b   : > { %v285_v17 = vpop.permute.xlu0 %284 }
 0x23c   : > { %v287_v18 = vmul.f32 %v285_v17, %v187_v1  ;;  %v288_v19 = vmul.f32 %v285_v17, %v189_v2 }
 0x23e   : > { %v291_v20 = vcombine.low %v287_v18, %v288_v19 }
 0x240   : > { %293 = vst [vmem:[%s186_s10] sm:$0xff] %v291_v20 }
 0x241   : > { %503 = shalt.err (!%p500_p4)
}
 0x242   : > { %s504_s29 = scalar_lea.hbm %s710_s20, 128  ;;  %s508_s7 = scalar_lea.hbm %s757_s3, 256 }
 0x243   : > { %p505_p5 = scmp.ne.s32.totalorder %s710_s20, %s504_s29  ;;  %p509_p0 = scmp.lt.u32.totalorder %s710_s20, %s757_s3 }
 0x244   : > { %p510_p1 = scmp.lt.u32.totalorder %s508_s7, %s504_s29  ;;  %p512_p6 = scmp.lt.u32.totalorder %s504_s29, %s710_s20 }
 0x245   : > { %p506_p8 = pnand %p505_p5, %p766_p11 }
 0x246   : > { %p511_p3 = por %p510_p1, %p509_p0 }
 0x247   : > { %p507_p9 = pneg %p506_p8 }
 0x248   : > { %p513_p12 = por %p512_p6, %p511_p3 }
 0x24a   : > { %p514_p13 = pnand %p513_p12, %p507_p9 }
 0x24c   : > { %517 = shalt.err (!%p514_p13)
}
 0x24d   : > { %407 = dma.vmem_to_hbm [thread:$0]  (%p766_p11), %s712_s11, 128, %s710_s20, %s295_s22  }
 0x24e PF: > { %s321_s23 = sand.u32 1, %s544_s12   ;;  %p767_p7 = scmp.ne.s32.totalorder %s762_s25, 0 }
 0x24f   : > { %p768_p10 = scmp.ge.s32.totalorder %s556_s15, 2  ;;  %s322_s8 = scalar_lea.sflag [#allocation4], %s321_s23 }
 0x251   : > { %p414_p2 = pnand %p768_p10, %p767_p7 }
 0x253   : > { %539 = dma.done.wait (!%p414_p2), %s322_s8, 128  }
 0x254   : > { %541 = vsyncadd (!%p414_p2), %s322_s8, 4294967168  ;;  %p16_p4 = scmp.ge.s32.totalorder %s608_s18, 4   ;;  %s769_s12 = smov %s548_s13 }
 0x255   : > { %s770_s13 = smov %s552_s14  ;;  %s771_s14 = smov %s620_s21 }
 0x256   : > { %s772_s15 = smov %s608_s18  ;;  %18 = sbr.rel (!%p16_p4) target bundleno = 5 (0x5), region = 77 }
 0x25d   :  { %327 = vsyncpa [#allocation3], 1 }
 0x25e   :  { %329 = vsyncpa [#allocation3 + $0x1], 1 }
 0x25f   :  { %330 = vsyncpa [#allocation4], 1 }
 0x260   :  { %332 = vsyncpa [#allocation4 + $0x1], 1 }

</bundles_post_ra>
